<compile_context>
chip_gen: v7x
topology: tpu7x:2x2x1
jax: 0.10.0
libtpu: 0.0.40
codegen_flags: <defaults>
</compile_context>

<pallas_src>
import functools

import jax
import jax.numpy as jnp
from jax import lax
from jax.experimental import pallas as pl
from jax.experimental.pallas import tpu as pltpu


# ----------------------------- Pallas kernels ------------------------------

def _upconv_kernel(x_ref, w_ref, b_ref, o_ref):
    """ConvTranspose2d(kernel=2, stride=2), one kh tap per grid step.

    x_ref: (NB, H*W, Cin)  f32   NB images
    w_ref: (Cin, 2*Cup)    bf16  columns ordered (kw, co) for this kh
    b_ref: (1, 2*Cup)      f32   bias tiled over kw
    o_ref: (NB, H, W, 2*Cup) f32 -> HBM array (N, H, 2, W, 2*Cup), which is a
           free row-major reshape of the upsampled (N, 2H, 2W, Cup) image.
    """
    NB, HW, Cin = x_ref.shape
    _, H, W, C2 = o_ref.shape
    xm = x_ref[...].reshape(NB * HW, Cin).astype(jnp.bfloat16)
    y = jnp.dot(xm, w_ref[...], preferred_element_type=jnp.float32)
    y = y + b_ref[...]
    o_ref[...] = y.reshape(NB, H, W, C2).astype(o_ref.dtype)


def _doubleconv_kernel(up_ref, clip_ref, dino_ref,
                       w1_ref, g1_ref, b1_ref,
                       w2_ref, g2_ref, b2_ref,
                       o_ref, slab1, slab2,
                       *, Hi, Wi, guard, groups, eps):
    """Fused DoubleConv for one image on the (Hi, Wi) grid.

    up_ref:   (1, Hi*Wi, Cup)  f32   upsampled features (spatial-flattened)
    clip_ref: (1, Hi*Wi, Cc)   f32   guidance (BlockSpec broadcasts over T)
    dino_ref: (1, Hi*Wi, Cd)   f32
    w1_ref:   (9*C1, Cmid)     bf16  rows = (tap dy*3+dx, fused channel)
    w2_ref:   (9*Cmid, Cout)   bf16
    g*/b*:    (1, C)           f32   GroupNorm affine params
    o_ref:    (1, Hi*Wi, Cout) f32
    slab1:    VMEM (Hi*Wi + 2*guard, C1)   f32  fused, guard-padded input slab
    slab2:    VMEM (Hi*Wi + 2*guard, Cmid) f32  conv2 input slab
    """
    M = Hi * Wi
    Cup = up_ref.shape[-1]
    Cc = clip_ref.shape[-1]
    C1 = slab1.shape[-1]
    Cmid = slab2.shape[-1]

    # --- zero the guard rows (replaces wrapper-side jnp.pad halo) ---
    slab1[pl.ds(0, guard), :] = jnp.zeros((guard, C1), slab1.dtype)
    slab1[pl.ds(guard + M, guard), :] = jnp.zeros((guard, C1), slab1.dtype)
    slab2[pl.ds(0, guard), :] = jnp.zeros((guard, Cmid), slab2.dtype)
    slab2[pl.ds(guard + M, guard), :] = jnp.zeros((guard, Cmid), slab2.dtype)

    # --- in-VMEM channel concat (replaces HBM repeat + concatenate) ---
    slab1[pl.ds(guard, M), 0:Cup] = up_ref[0]
    slab1[pl.ds(guard, M), Cup:Cup + Cc] = clip_ref[0]
    slab1[pl.ds(guard, M), Cup + Cc:C1] = dino_ref[0]

    # width-validity masks (the flat slab wraps horizontally; height handled
    # by the zero guard rows).  Hoisted once, f32 so the VPU math stays f32.
    wq = lax.broadcasted_iota(jnp.int32, (M, 1), 0) % Wi
    mask_l = (wq >= 1).astype(jnp.float32)        # reading column w-1
    mask_r = (wq <= Wi - 2).astype(jnp.float32)   # reading column w+1

    def conv3x3(slab, w_ref):
        # im2col: 9 sublane-shifted slices of the flat slab, concatenated on
        # lanes -> a single MXU matmul with K = 9*Cin (bf16 operands, f32 acc).
        cols = []
        for dy in range(3):
            for dx in range(3):
                s = (dy - 1) * Wi + (dx - 1)
                xs = slab[pl.ds(guard + s, M), :]
                if dx == 0:
                    xs = xs * mask_l
                elif dx == 2:
                    xs = xs * mask_r
                cols.append(xs)
        xcol = jnp.concatenate(cols, axis=-1).astype(jnp.bfloat16)
        return jnp.dot(xcol, w_ref[...], preferred_element_type=jnp.float32)

    def gn_relu(acc, gamma, beta):
        # Per-sample GroupNorm with centered (two-pass) statistics, f32.
        C = acc.shape[-1]
        cg = C // groups
        cnt_inv = 1.0 / float(M * cg)
        cid = lax.broadcasted_iota(jnp.int32, (1, C), 1)
        s1 = jnp.sum(acc, axis=0, keepdims=True)                  # (1, C)
        mean_vec = jnp.zeros((1, C), jnp.float32)
        for g in range(groups):
            gm = jnp.logical_and(cid >= g * cg,
                                 cid < (g + 1) * cg).astype(jnp.float32)
            mg = jnp.sum(s1 * gm, axis=1, keepdims=True) * cnt_inv
            mean_vec = mean_vec + mg * gm
        d = acc - mean_vec
        s2 = jnp.sum(d * d, axis=0, keepdims=True)                # (1, C)
        inv_vec = jnp.zeros((1, C), jnp.float32)
        for g in range(groups):
            gm = jnp.logical_and(cid >= g * cg,
                                 cid < (g + 1) * cg).astype(jnp.float32)
            vg = jnp.sum(s2 * gm, axis=1, keepdims=True) * cnt_inv
            inv_vec = inv_vec + lax.rsqrt(vg + eps) * gm
        y = d * inv_vec * gamma + beta
        return jnp.maximum(y, 0.0)

    acc1 = conv3x3(slab1, w1_ref)                                 # (M, Cmid) f32
    act1 = gn_relu(acc1, g1_ref[...], b1_ref[...])
    slab2[pl.ds(guard, M), :] = act1
    acc2 = conv3x3(slab2, w2_ref)                                 # (M, Cout) f32
    out = gn_relu(acc2, g2_ref[...], b2_ref[...])
    o_ref[...] = out[None].astype(o_ref.dtype)


# ------------------------------ wrappers ------------------------------------

def _upconv(x_flat, w_up, b_up, H, W):
    """x_flat: (N, H*W, Cin) -> (N, H, 2, W, 2*Cup) (free-reshapes to NHWC)."""
    N, HW, Cin = x_flat.shape
    C2 = w_up.shape[-1]                     # 2*Cup
    NB = 2 if (N % 2 == 0 and N >= 2) else 1
    return pl.pallas_call(
        _upconv_kernel,
        out_shape=jax.ShapeDtypeStruct((N, H, 2, W, C2), jnp.float32),
        grid=(N // NB, 2),
        in_specs=[
            pl.BlockSpec((NB, HW, Cin), lambda nb, kh: (nb, 0, 0)),
            pl.BlockSpec((None, Cin, C2), lambda nb, kh: (kh, 0, 0)),
            pl.BlockSpec((1, C2), lambda nb, kh: (0, 0)),
        ],
        out_specs=pl.BlockSpec((NB, H, None, W, C2),
                               lambda nb, kh: (nb, 0, kh, 0, 0)),
        compiler_params=pltpu.CompilerParams(
            dimension_semantics=("parallel", "parallel")),
    )(x_flat, w_up, b_up)


def _double_conv(up_flat, clip_flat, dino_flat, w1, g1, b1, w2, g2, b2,
                 Hi, Wi, num_groups, eps=1e-5):
    N, M, Cup = up_flat.shape
    Cc = clip_flat.shape[-1]
    Cd = dino_flat.shape[-1]
    C1 = Cup + Cc + Cd
    Cmid = w1.shape[-1]
    Cout = w2.shape[-1]
    T = N // clip_flat.shape[0]
    Td = N // dino_flat.shape[0]
    guard = ((Wi + 1 + 7) // 8) * 8          # zero guard rows, sublane aligned

    kern = functools.partial(_doubleconv_kernel, Hi=Hi, Wi=Wi, guard=guard,
                             groups=num_groups, eps=eps)
    out = pl.pallas_call(
        kern,
        out_shape=jax.ShapeDtypeStruct((N, M, Cout), jnp.float32),
        grid=(N,),
        in_specs=[
            pl.BlockSpec((1, M, Cup), lambda n: (n, 0, 0)),
            pl.BlockSpec((1, M, Cc), lambda n: (n // T, 0, 0)),    # free T-broadcast
            pl.BlockSpec((1, M, Cd), lambda n: (n // Td, 0, 0)),
            pl.BlockSpec((9 * C1, Cmid), lambda n: (0, 0)),
            pl.BlockSpec((1, Cmid), lambda n: (0, 0)),
            pl.BlockSpec((1, Cmid), lambda n: (0, 0)),
            pl.BlockSpec((9 * Cmid, Cout), lambda n: (0, 0)),
            pl.BlockSpec((1, Cout), lambda n: (0, 0)),
            pl.BlockSpec((1, Cout), lambda n: (0, 0)),
        ],
        out_specs=pl.BlockSpec((1, M, Cout), lambda n: (n, 0, 0)),
        scratch_shapes=[
            pltpu.VMEM((M + 2 * guard, C1), jnp.float32),
            pltpu.VMEM((M + 2 * guard, Cmid), jnp.float32),
        ],
        compiler_params=pltpu.CompilerParams(
            dimension_semantics=("parallel",),
            vmem_limit_bytes=32 * 1024 * 1024),
    )(up_flat, clip_flat, dino_flat, w1, g1, b1, w2, g2, b2)
    return out


# ------------------------- FusionUP (params + forward) ----------------------

def init_fusion_up_params(key, in_channels, out_channels,
                          clip_guidance_channels, dino_guidance_channels):
    up_out = in_channels - clip_guidance_channels
    cat_in = in_channels + dino_guidance_channels
    mid = out_channels
    ks = jax.random.split(key, 8)
    s = 0.05
    return dict(
        # ConvTranspose2d weight, torch layout (Cin, Cout, kh, kw)
        up_w=s * jax.random.normal(ks[0], (in_channels, up_out, 2, 2), jnp.float32),
        up_b=s * jax.random.normal(ks[1], (up_out,), jnp.float32),
        # Conv2d weights stored HWIO (bias=False in the module)
        conv1_w=s * jax.random.normal(ks[2], (3, 3, cat_in, mid), jnp.float32),
        gn1_gamma=1.0 + 0.1 * jax.random.normal(ks[3], (mid,), jnp.float32),
        gn1_beta=0.1 * jax.random.normal(ks[4], (mid,), jnp.float32),
        conv2_w=s * jax.random.normal(ks[5], (3, 3, mid, out_channels), jnp.float32),
        gn2_gamma=1.0 + 0.1 * jax.random.normal(ks[6], (mid,), jnp.float32),
        gn2_beta=0.1 * jax.random.normal(ks[7], (mid,), jnp.float32),
    )


def fusion_up_forward(params, x_nchw, clip_nchw, dino_nchw, *, num_groups):
    N, Cin, H, W = x_nchw.shape
    Hi, Wi = 2 * H, 2 * W

    # ConvTranspose weights, per-kh: (kh, Cin, kw*Cup+co), bf16 for the MXU.
    up_w = params["up_w"]                                  # (Cin, Cup, 2, 2)
    Cup = up_w.shape[1]
    w_up = jnp.transpose(up_w, (2, 0, 3, 1)).reshape(2, Cin, 2 * Cup)
    w_up = w_up.astype(jnp.bfloat16)
    b_up = jnp.tile(params["up_b"], 2).reshape(1, 2 * Cup).astype(jnp.float32)

    x_flat = jnp.transpose(x_nchw, (0, 2, 3, 1)).reshape(N, H * W, Cin)

    up5 = _upconv(x_flat, w_up, b_up, H, W)                # (N, H, 2, W, 2*Cup)
    up_flat = up5.reshape(N, Hi * Wi, Cup)                 # free reshape to NHWC-flat

    def _flat(g_nchw):
        B, C = g_nchw.shape[:2]
        return jnp.transpose(g_nchw, (0, 2, 3, 1)).reshape(B, Hi * Wi, C)

    clip_flat = _flat(clip_nchw)
    dino_flat = _flat(dino_nchw)

    C1 = Cup + clip_flat.shape[-1] + dino_flat.shape[-1]
    Cmid = params["conv1_w"].shape[-1]
    Cout = params["conv2_w"].shape[-1]
    w1 = params["conv1_w"].reshape(9 * C1, Cmid).astype(jnp.bfloat16)
    w2 = params["conv2_w"].reshape(9 * Cmid, Cout).astype(jnp.bfloat16)
    g1 = params["gn1_gamma"].reshape(1, Cmid).astype(jnp.float32)
    b1 = params["gn1_beta"].reshape(1, Cmid).astype(jnp.float32)
    g2 = params["gn2_gamma"].reshape(1, Cout).astype(jnp.float32)
    b2 = params["gn2_beta"].reshape(1, Cout).astype(jnp.float32)

    out = _double_conv(up_flat, clip_flat, dino_flat, w1, g1, b1, w2, g2, b2,
                       Hi, Wi, num_groups)                 # (N, Hi*Wi, Cout)
    out = out.reshape(N, Hi, Wi, Cout)
    return jnp.transpose(out, (0, 3, 1, 2))                # NHWC -> NCHW


# ------------------------------ pure-JAX reference ---------------------------

def _gn_ref(x, gamma, beta, G, eps=1e-5):
    N, H, W, C = x.shape
    xg = x.reshape(N, H, W, G, C // G)
    mean = xg.mean(axis=(1, 2, 4), keepdims=True)
    var = xg.var(axis=(1, 2, 4), keepdims=True)
    xn = ((xg - mean) / jnp.sqrt(var + eps)).reshape(N, H, W, C)
    return xn * gamma.reshape(1, 1, 1, C) + beta.reshape(1, 1, 1, C)


def fusion_up_reference(params, x_nchw, clip_nchw, dino_nchw, *, num_groups):
    x = jnp.transpose(x_nchw, (0, 2, 3, 1))
    N, H, W, Cin = x.shape
    up_w = params["up_w"]
    Cup = up_w.shape[1]
    y = jnp.einsum('nhwc,cokl->nhkwlo', x, up_w).reshape(N, 2 * H, 2 * W, Cup)
    y = y + params["up_b"].reshape(1, 1, 1, Cup)

    def _rep(g_nchw):
        g = jnp.transpose(g_nchw, (0, 2, 3, 1))
        T = y.shape[0] // g.shape[0]
        return jnp.repeat(g, T, axis=0)

    y = jnp.concatenate([y, _rep(clip_nchw), _rep(dino_nchw)], axis=-1)

    def conv_block(z, w, gamma, beta):
        z = lax.conv_general_dilated(z, w, (1, 1), ((1, 1), (1, 1)),
                                     dimension_numbers=('NHWC', 'HWIO', 'NHWC'))
        z = _gn_ref(z, gamma, beta, num_groups)
        return jnp.maximum(z, 0.0)

    y = conv_block(y, params["conv1_w"], params["gn1_gamma"], params["gn1_beta"])
    y = conv_block(y, params["conv2_w"], params["gn2_gamma"], params["gn2_beta"])
    return jnp.transpose(y, (0, 3, 1, 2))


# ----------------------------------- main ------------------------------------

if __name__ == "__main__":
    in_channels = 32
    out_channels = 32
    clip_c = 8
    dino_c = 8
    B, T = 2, 2
    H = W = 8

    key = jax.random.PRNGKey(0)
    kp, kx, kc, kd = jax.random.split(key, 4)
    params = init_fusion_up_params(kp, in_channels, out_channels, clip_c, dino_c)

    x = jax.random.normal(kx, (B * T, in_channels, H, W), jnp.float32)
    clip_guidance = jax.random.normal(kc, (B, clip_c, 2 * H, 2 * W), jnp.float32)
    dino_guidance = jax.random.normal(kd, (B, dino_c, 2 * H, 2 * W), jnp.float32)

    num_groups = out_channels // 16   # GroupNorm(mid_channels // 16, mid_channels)

    out = fusion_up_forward(params, x, clip_guidance, dino_guidance,
                            num_groups=num_groups)
    out = jax.block_until_ready(out)

    ref = fusion_up_reference(params, x, clip_guidance, dino_guidance,
                              num_groups=num_groups)
    ref = jax.block_until_ready(ref)

    assert out.shape == (B * T, out_channels, 2 * H, 2 * W)
    # tighter than before (bf16-matmul path): max observed error is a few 1e-3
    assert bool(jnp.allclose(out, ref, rtol=3e-2, atol=3e-2)), (
        "max abs diff = %f" % float(jnp.max(jnp.abs(out - ref))))
    print("KERNEL_OK")
</pallas_src>

<mosaic_0001>
module attributes {stable_mosaic.version = 11 : i64} {
  func.func @_upconv_kernel(%arg0: i32, %arg1: i32, %arg2: memref<2x64x32xf32, #tpu.memory_space<vmem>>, %arg3: memref<1x32x48xbf16, #tpu.memory_space<vmem>>, %arg4: memref<1x48xf32, #tpu.memory_space<vmem>>, %arg5: memref<2x8x1x8x48xf32, #tpu.memory_space<vmem>>) attributes {dimension_semantics = [#tpu.dimension_semantics<parallel>, #tpu.dimension_semantics<parallel>], iteration_bounds = array<i64: 2, 2>, scalar_prefetch = 0 : i64, scratch_operands = 0 : i64, tpu.core_type = #tpu.core_type<tc>, window_params = [{transform_indices = @transform_0, window_bounds = array<i64: 2, 64, 32>}, {transform_indices = @transform_1, window_bounds = array<i64: 1, 32, 48>}, {pipeline_mode = #tpu.pipeline_mode<synchronous>, transform_indices = @transform_2, window_bounds = array<i64: 1, 48>}, {transform_indices = @transform_3, window_bounds = array<i64: 2, 8, 1, 8, 48>}]} {
    %c0 = arith.constant 0 : index
    %c0_0 = arith.constant 0 : index
    %c0_1 = arith.constant 0 : index
    %0 = vector.load %arg2[%c0, %c0_0, %c0_1] : memref<2x64x32xf32, #tpu.memory_space<vmem>>, vector<2x64x32xf32>
    %1 = vector.shape_cast %0 : vector<2x64x32xf32> to vector<128x32xf32>
    %2 = arith.truncf %1 : vector<128x32xf32> to vector<128x32xbf16>
    %c0_2 = arith.constant 0 : index
    %c0_3 = arith.constant 0 : index
    %c0_4 = arith.constant 0 : index
    %3 = vector.load %arg3[%c0_2, %c0_3, %c0_4] : memref<1x32x48xbf16, #tpu.memory_space<vmem>>, vector<1x32x48xbf16>
    %4 = vector.shape_cast %3 : vector<1x32x48xbf16> to vector<32x48xbf16>
    %cst = arith.constant dense<0.000000e+00> : vector<128x48xf32>
    %5 = tpu.matmul %2, %4, %cst {dimension_numbers = #tpu.dot_dimension_numbers<[1], [0], [0], [1], [0, 0, 1, 1], [], []>} : vector<128x32xbf16>, vector<32x48xbf16>, vector<128x48xf32> -> vector<128x48xf32>
    %c0_5 = arith.constant 0 : index
    %c0_6 = arith.constant 0 : index
    %6 = vector.load %arg4[%c0_5, %c0_6] : memref<1x48xf32, #tpu.memory_space<vmem>>, vector<1x48xf32>
    %7 = vector.broadcast %6 : vector<1x48xf32> to vector<128x48xf32>
    %8 = arith.addf %5, %7 : vector<128x48xf32>
    %9 = vector.shape_cast %8 : vector<128x48xf32> to vector<2x8x8x48xf32>
    %c0_7 = arith.constant 0 : index
    %c0_8 = arith.constant 0 : index
    %c0_9 = arith.constant 0 : index
    %c0_10 = arith.constant 0 : index
    %c0_11 = arith.constant 0 : index
    %10 = vector.load %arg5[%c0_7, %c0_8, %c0_9, %c0_10, %c0_11] : memref<2x8x1x8x48xf32, #tpu.memory_space<vmem>>, vector<2x8x1x8x48xf32>
    %11 = vector.shape_cast %10 : vector<2x8x1x8x48xf32> to vector<2x8x8x48xf32>
    %12 = vector.shape_cast %9 : vector<2x8x8x48xf32> to vector<2x8x1x8x48xf32>
    tpu.vector_store %arg5[%c0_7, %c0_8, %c0_9, %c0_10, %c0_11], %12 {strides = array<i32>} : memref<2x8x1x8x48xf32, #tpu.memory_space<vmem>>, vector<2x8x1x8x48xf32>,
    return
  }
  func.func @transform_0(%arg0: i32, %arg1: i32) -> (i32, i32, i32) {
    %c0_i32 = arith.constant 0 : i32
    %c0_i32_0 = arith.constant 0 : i32
    %c0_i32_1 = arith.constant 0 : i32
    return %arg0, %c0_i32, %c0_i32_0 : i32, i32, i32
  }
  func.func @transform_1(%arg0: i32, %arg1: i32) -> (i32, i32, i32) {
    %c0_i32 = arith.constant 0 : i32
    %c0_i32_0 = arith.constant 0 : i32
    %c0_i32_1 = arith.constant 0 : i32
    return %arg1, %c0_i32, %c0_i32_0 : i32, i32, i32
  }
  func.func @transform_2(%arg0: i32, %arg1: i32) -> (i32, i32) {
    %c0_i32 = arith.constant 0 : i32
    %c0_i32_0 = arith.constant 0 : i32
    %c0_i32_1 = arith.constant 0 : i32
    return %c0_i32, %c0_i32_0 : i32, i32
  }
  func.func @transform_3(%arg0: i32, %arg1: i32) -> (i32, i32, i32, i32, i32) {
    %c0_i32 = arith.constant 0 : i32
    %c0_i32_0 = arith.constant 0 : i32
    %c0_i32_1 = arith.constant 0 : i32
    %c0_i32_2 = arith.constant 0 : i32
    return %arg0, %c0_i32, %arg1, %c0_i32_0, %c0_i32_1 : i32, i32, i32, i32, i32
  }
}

</mosaic_0001>

<bundles_post_ra>
// kernel: tpu_custom_call.1
= control target key start
LH: loop header
LB: loop body
LE: loop exit
PB: predicated region body
PF: predicated region fallthrough
CT: control target
= control target key end

     0   :  { %8 = vsyncpa [#allocation3], 0  ;;  %s970_s0 = inlined_call_operand.vmem [shape: f32[4,64,32], index: 0, kind: input, shape index: {}]   ;;  %s971_s1 = inlined_call_operand.vmem [shape: bf16[2,32,48], index: 1, kind: input, shape index: {}]   ;;  %s972_s2 = inlined_call_operand.vmem [shape: f32[1,48], index: 2, kind: input, shape index: {}]   ;;  %s973_s3 = inlined_call_operand.hbm [shape: f32[4,8,2,8,48], index: 3, kind: output, shape index: {}]  }
   0x1   :  { %10 = vsyncpa [#allocation3 + $0x1], 0  ;;  %s760_s12 = smov 0   ;;  %s762_s13 = smov 0  }
   0x2   :  { %s764_s14 = smov 0   ;;  %s766_s15 = smov 0  }
   0x3   :  { %s768_s16 = smov 0   ;;  %s770_s17 = smov 0  }
   0x4   :  { %s772_s18 = smov 0   ;;  %s774_s19 = smov 0  }
   0x5 LB: > { %s499_s20 = sadd.s32 4294967295, %s734_s19   ;;  %s500_s21 = sadd.s32 4294967294, %s734_s19   ;;  %s734_s19 = sphi %s774_s19, %s16_s19   ;;  %s730_s18 = sphi %s772_s18, %s982_s18   ;;  %s726_s17 = sphi %s770_s17, %s981_s17   ;;  %s722_s16 = sphi %s768_s16, %s980_s16   ;;  %s718_s15 = sphi %s766_s15, %s979_s15   ;;  %s714_s14 = sphi %s764_s14, %s978_s14   ;;  %s710_s13 = sphi %s762_s13, %s977_s13   ;;  %s706_s12 = sphi %s760_s12, %s976_s12  }
   0x6   : > { %s25_s22 = sadd.s32 1, %s726_s17  ;;  %s28_s23 = sadd.s32 1, %s730_s18 }
   0x7   : > { %p26_p0 = scmp.ge.s32.totalorder %s25_s22, 2  ;;  %p120_p1 = scmp.ne.s32.totalorder %s714_s14, %s710_s13 }
   0x8   : > { %p121_p2 = scmp.eq.s32.totalorder %s499_s20, 3  ;;  %p126_p5 = scmp.ne.s32.totalorder %s710_s13, %s706_s12 }
   0x9   : > { %s984_s22 = smov (%p26_p0, %s25_s22), 0  ;;  %s986_s23 = smov (!%p26_p0, %s28_s23), %s730_s18 }
   0xa   : > { %s106_s24 = ssub.s32 %s726_s17, %s984_s22  ;;  %p811_p3 = por %p121_p2, %p120_p1 }
   0xb   : > { %p30_p4 = scmp.ge.s32.totalorder %s986_s23, 2  ;;  %p127_p6 = scmp.eq.s32.totalorder %s500_s21, 3 }
   0xc   : > { %p503_p7 = scmp.ge.s32.totalorder %s734_s19, 1  ;;  %p166_p9 = scmp.lt.s32.totalorder %s734_s19, 5 }
   0xd   : > { %s988_s23 = smov (%p30_p4, %s986_s23), 0  ;;  %p820_p8 = por %p127_p6, %p126_p5 }
   0xe   : > { %s105_s27 = ssub.s32 %s730_s18, %s988_s23  ;;  %s110_s28 = sadd.s32 1, %s714_s14 }
   0xf   : > { %s107_s29 = sor.u32 %s106_s24, %s105_s27  ;;  %p167_p10 = pnand %p503_p7, %p166_p9 }
  0x10   : > { %p108_p11 = scmp.eq.s32.totalorder %s107_s29, 0  ;;  %p203_p12 = scmp.lt.s32.totalorder (!%p167_p10), %s718_s15, 1  ;;  %vm257_vm0 = vcmask (!%p167_p10), 261120   ;;  %v510_v26 = vld [vmem:[%s972_s2] ss:$0 sm:$0xff] (!%p167_p10)  ;;  %vm379_vm1 = vcmask (!%p167_p10), 392192  }
  0x11   : > { %170 = sbr.rel (%p167_p10) target bundleno = 278 (0x116), region = 32  ;;  %s505_s4 = sshll.u32 (!%p167_p10), %s722_s16, 1 }
  0x12   : > { %s829_s30 = scalar_select %p108_p11, %s714_s14, %s110_s28  }
  0x13   : > { %p197_p13 = scmp.lt.s32.totalorder (!%p167_p10), %s505_s4, 3  ;;  %s193_s24 = sand.u32 (!%p167_p10), 1, %s710_s13  }
  0x14   : > { %s504_s27 = sshll.u32 (!%p167_p10), %s193_s24, 7  ;;  %s736_s20 = smov (!%p167_p10), [#allocation2]  }
  0x18   : > { %s204_s5 = scalar_select %p203_p12, %s718_s15, 1 }
  0x19   : > { %s990_s4 = smov (!%p197_p13, %s505_s4), 3 }
  0x1a   : > { %s528_s6 = sshll.u32 %s204_s5, 4  ;;  %s527_s10 = sshll.u32 %s990_s4, 6 }
  0x1b   : > { %s207_s9 = scalar_lea.vmem %s971_s1, %s528_s6  ;;  %s840_s21 = scalar_lea.vmem %s970_s0, %s527_s10 }
  0x1c   : > { %v638_v0 = vld [vmem:[%s207_s9] sm:$0xff]   ;;  %v639_v1 = vld [vmem:[%s207_s9 + $0x8] sm:$0xff]   ;;  %v212_v7 = vld [vmem:[%s840_s21 + $0x10] sm:$0xff]  ;;  %s529_s4 = sshll.u32 %s722_s16, 5  ;;  %s873_s5 = scalar_lea.vmem [#allocation2], %s504_s27 }
  0x1d   : > { %540 = vmatprep.subr.bf16.mxu0 %v638_v0  ;;  %560 = vmatprep.subr.bf16.mxu1 %v638_v0  ;;  %v210_v2 = vld [vmem:[%s840_s21] sm:$0xff]  ;;  %v211_v3 = vld [vmem:[%s840_s21 + $0x8] sm:$0xff]  ;;  %v213_v8 = vld [vmem:[%s840_s21 + $0x18] sm:$0xff]  ;;  %s409_s16 = sadd.s32 %s718_s15, %s529_s4  ;;  %s412_s7 = sshll.u32 %s873_s5, 4  ;;  %s902_s7 = int_to_ptr.vmem [resolvable:$true] %s412_s7 }
  0x1e   : > { %v218_v4 = vld [vmem:[%s840_s21 + $0x40] sm:$0xff]  ;;  %541 = vmatpush3.bf16.msra.mxu0 %v638_v0  ;;  %562 = vmatpush3.bf16.msra.mxu1 %v638_v0  ;;  %v226_v5 = vpack.c.bf16 %v211_v3, %v210_v2  ;;  %v219_v6 = vld [vmem:[%s840_s21 + $0x48] sm:$0xff]  ;;  %v220_v10 = vld [vmem:[%s840_s21 + $0x50] sm:$0xff]  ;;  %v227_v16 = vpack.c.bf16 %v213_v8, %v212_v7  ;;  %s524_s6 = sshll.u32 %s409_s16, 7  ;;  %s918_s10 = scalar_lea.sflag [#allocation3], %s193_s24 }
  0x1f   : > { %542 = vmatprep.subr.bf16.mxu0 %v639_v1  ;;  %561 = vmatprep.subr.bf16.mxu1 %v639_v1  ;;  %v230_v9 = vpack.c.bf16 %v219_v6, %v218_v4  ;;  %v221_v11 = vld [vmem:[%s840_s21 + $0x58] sm:$0xff]  ;;  %v214_v12 = vld [vmem:[%s840_s21 + $0x20] sm:$0xff]  ;;  %v215_v13 = vld [vmem:[%s840_s21 + $0x28] sm:$0xff]  ;;  %s896_s9 = scalar_lea.hbm %s973_s3, %s524_s6  ;;  %s640_s11 = scalar_lea.vmem %s902_s7, 2048 }
  0x20   : > { %544 = vmatprep.mubr.msk.bf16.mxu0 %vm257_vm0, %v226_v5  ;;  %v222_v14 = vld [vmem:[%s840_s21 + $0x60] sm:$0xff]  ;;  %v223_v15 = vld [vmem:[%s840_s21 + $0x68] sm:$0xff]  ;;  %v231_v17 = vpack.c.bf16 %v221_v11, %v220_v10  ;;  %v228_v18 = vpack.c.bf16 %v215_v13, %v214_v12  ;;  %v216_v20 = vld [vmem:[%s840_s21 + $0x30] sm:$0xff]  ;;  %p641_p0 = scmp.ne.s32.totalorder %s902_s7, %s640_s11 }
  0x21   : > { %552 = vmatprep.mubr.msk.bf16.mxu1 %vm257_vm0, %v230_v9  ;;  %v232_v19 = vpack.c.bf16 %v223_v15, %v222_v14  ;;  %v217_v21 = vld [vmem:[%s840_s21 + $0x38] sm:$0xff]  ;;  %v224_v22 = vld [vmem:[%s840_s21 + $0x70] sm:$0xff] }
  0x22   : > { %543 = vmatpush3.bf16.msra.mxu0 %v639_v1  ;;  %563 = vmatpush3.bf16.msra.mxu1 %v639_v1  ;;  %v225_v23 = vld [vmem:[%s840_s21 + $0x78] sm:$0xff]  ;;  %v229_v24 = vpack.c.bf16 %v217_v21, %v216_v20  ;;  %p642_p1 = pnand %p641_p0, %p811_p3  ;;  %s644_s21 = sshll.u32 %s736_s20, 4  ;;  %s645_s21 = int_to_ptr.vmem [resolvable:$false] %s644_s21 }
  0x23   : > { %v233_v25 = vpack.c.bf16 %v225_v23, %v224_v22  ;;  %s646_s27 = scalar_lea.vmem %s645_s21, 4096  ;;  %p647_p4 = scmp.lt.s32.totalorder %s902_s7, %s645_s21 }
  0x24   : > { %p643_p2 = pneg %p642_p1  ;;  %p648_p5 = scmp.lt.s32.totalorder %s646_s27, %s640_s11 }
  0x25   : > { %545 = vmatmul.mubr.msk.bf16.vlgmr.msra.gmra.mrb[0].mxu0 %vm257_vm0, %v227_v16  ;;  %553 = vmatmul.mubr.msk.bf16.vlgmr.msra.gmra.mrb[0].mxu1 %vm257_vm0, %v231_v17 }
  0x26   : > { %548 = vmatprep.mubr.msk.bf16.mxu0 %vm257_vm0, %v228_v18  ;;  %556 = vmatprep.mubr.msk.bf16.mxu1 %vm257_vm0, %v232_v19  ;;  %p649_p6 = por %p648_p5, %p647_p4 }
  0x28   : > { %p650_p7 = pnand %p649_p6, %p643_p2 }
  0x2d   : > { %549 = vmatmul.mubr.msk.bf16.gmra.mrb[4].mxu0 %vm257_vm0, %v229_v24  ;;  %557 = vmatmul.mubr.msk.bf16.gmra.mrb[4].mxu1 %vm257_vm0, %v233_v25 }
  0xf8   : > { %v546_v27 = vpop.f32.mrb[0].mxu0  ;;  %v554_v28 = vpop.f32.mrb[0].mxu1 }
  0xf9   : > { %v325_v29 = vadd.f32 %v546_v27, %v510_v26  ;;  %v357_v30 = vadd.f32 %v554_v28, %v510_v26  ;;  %v316_v31 = vpop.f32.mrb[1].mxu0  ;;  %v348_v32 = vpop.f32.mrb[1].mxu1 }
  0xfa   : > { %v317_v33 = vadd.f32 %v510_v26, %v316_v31  ;;  %v349_v34 = vadd.f32 %v510_v26, %v348_v32  ;;  %v547_v35 = vpop.f32.mrb[2].mxu0  ;;  %v555_v36 = vpop.f32.mrb[2].mxu1 }
  0xfb   : > { %382 = vst.msk [vmem:[%s873_s5 + $0x10] sm:$0xff] %vm379_vm1, %v325_v29  ;;  %390 = vst.msk [vmem:[%s873_s5 + $0x50] sm:$0xff] %vm379_vm1, %v357_v30  ;;  %v328_v37 = vadd.f32 %v547_v35, %v510_v26  ;;  %v360_v38 = vadd.f32 %v555_v36, %v510_v26  ;;  %v319_v39 = vpop.f32.mrb[3].mxu0  ;;  %v351_v40 = vpop.f32.mrb[3].mxu1 }
  0xfc   : > { %380 = vst.msk [vmem:[%s873_s5] sm:$0xff] %vm379_vm1, %v317_v33  ;;  %388 = vst.msk [vmem:[%s873_s5 + $0x40] sm:$0xff] %vm379_vm1, %v349_v34  ;;  %v320_v41 = vadd.f32 %v510_v26, %v319_v39  ;;  %v352_v42 = vadd.f32 %v510_v26, %v351_v40 }
  0xfd   : > { %383 = vst.msk [vmem:[%s873_s5 + $0x18] sm:$0xff] %vm379_vm1, %v328_v37  ;;  %391 = vst.msk [vmem:[%s873_s5 + $0x58] sm:$0xff] %vm379_vm1, %v360_v38 }
  0xfe   : > { %381 = vst.msk [vmem:[%s873_s5 + $0x8] sm:$0xff] %vm379_vm1, %v320_v41  ;;  %389 = vst.msk [vmem:[%s873_s5 + $0x48] sm:$0xff] %vm379_vm1, %v352_v42 }
 0x100   : > { %v550_v43 = vpop.f32.mrb[4].mxu0  ;;  %v558_v44 = vpop.f32.mrb[4].mxu1 }
 0x101   : > { %v341_v45 = vadd.f32 %v550_v43, %v510_v26  ;;  %v373_v46 = vadd.f32 %v558_v44, %v510_v26  ;;  %v332_v47 = vpop.f32.mrb[5].mxu0  ;;  %v364_v48 = vpop.f32.mrb[5].mxu1 }
 0x102   : > { %v333_v49 = vadd.f32 %v510_v26, %v332_v47  ;;  %v365_v50 = vadd.f32 %v510_v26, %v364_v48  ;;  %v551_v51 = vpop.f32.mrb[6].mxu0  ;;  %v559_v52 = vpop.f32.mrb[6].mxu1 }
 0x103   : > { %386 = vst.msk [vmem:[%s873_s5 + $0x30] sm:$0xff] %vm379_vm1, %v341_v45  ;;  %394 = vst.msk [vmem:[%s873_s5 + $0x70] sm:$0xff] %vm379_vm1, %v373_v46  ;;  %v344_v53 = vadd.f32 %v551_v51, %v510_v26  ;;  %v376_v54 = vadd.f32 %v559_v52, %v510_v26  ;;  %v335_v55 = vpop.f32.mrb[7].mxu0  ;;  %v367_v56 = vpop.f32.mrb[7].mxu1 }
 0x104   : > { %384 = vst.msk [vmem:[%s873_s5 + $0x20] sm:$0xff] %vm379_vm1, %v333_v49  ;;  %392 = vst.msk [vmem:[%s873_s5 + $0x60] sm:$0xff] %vm379_vm1, %v365_v50  ;;  %v336_v57 = vadd.f32 %v510_v26, %v335_v55  ;;  %v368_v58 = vadd.f32 %v510_v26, %v367_v56 }
 0x105   : > { %387 = vst.msk [vmem:[%s873_s5 + $0x38] sm:$0xff] %vm379_vm1, %v344_v53  ;;  %395 = vst.msk [vmem:[%s873_s5 + $0x78] sm:$0xff] %vm379_vm1, %v376_v54 }
 0x106   : > { %385 = vst.msk [vmem:[%s873_s5 + $0x28] sm:$0xff] %vm379_vm1, %v336_v57  ;;  %393 = vst.msk [vmem:[%s873_s5 + $0x68] sm:$0xff] %vm379_vm1, %v368_v58 }
 0x107   : > { %653 = shalt.err (!%p650_p7)
}
 0x108   : > { %s654_s24 = scalar_lea.hbm %s896_s9, 2048  ;;  %s658_s4 = scalar_lea.hbm %s973_s3, 8192 }
 0x109   : > { %p655_p9 = scmp.ne.s32.totalorder %s896_s9, %s654_s24  ;;  %p659_p12 = scmp.lt.u32.totalorder %s896_s9, %s973_s3 }
 0x10a   : > { %p660_p13 = scmp.lt.u32.totalorder %s658_s4, %s654_s24  ;;  %p662_p1 = scmp.lt.u32.totalorder %s654_s24, %s896_s9 }
 0x10b   : > { %p656_p10 = pnand %p655_p9, %p811_p3 }
 0x10c   : > { %p661_p0 = por %p660_p13, %p659_p12 }
 0x10d   : > { %p657_p11 = pneg %p656_p10 }
 0x10e   : > { %p663_p2 = por %p662_p1, %p661_p0 }
 0x110   : > { %p664_p4 = pnand %p663_p2, %p657_p11 }
 0x112   : > { %667 = shalt.err (!%p664_p4)
}
 0x113   : > { %s737_s6 = smov 128   ;;  %s738_s15 = smov 256  }
 0x114   : > { %s739_s8 = smov 8  }
 0x115   : > { %564 = dma.vmem_to_hbm [thread:$0]  (%p811_p3), %s902_s7, 2048, %s896_s9, %s918_s10, %s737_s6, %s738_s15, %s739_s8  }
 0x116 PF: > { %p570_p5 = scmp.ge.s32.totalorder %s734_s19, 2  ;;  %s427_s11 = sand.u32 1, %s706_s12  }
 0x117   : > { %s428_s20 = scalar_lea.sflag [#allocation3], %s427_s11 }
 0x118   : > { %p567_p6 = pnand %p570_p5, %p820_p8 }
 0x11a   : > { %701 = dma.done.wait (!%p567_p6), %s428_s20, 2048  }
 0x11b   : > { %703 = vsyncadd (!%p567_p6), %s428_s20, 4294965248  ;;  %s16_s19 = sadd.s32 1, %s734_s19   ;;  %s976_s12 = smov %s710_s13 }
 0x11c   : > { %p13_p7 = scmp.ge.s32.totalorder %s16_s19, 6   ;;  %s977_s13 = smov %s714_s14 }
 0x11d   : > { %s978_s14 = smov %s829_s30  ;;  %s979_s15 = smov %s726_s17 }
 0x11e   : > { %s980_s16 = smov %s730_s18  ;;  %s981_s17 = smov %s984_s22 }
 0x11f   : > { %s982_s18 = smov %s988_s23  ;;  %15 = sbr.rel (!%p13_p7) target bundleno = 5 (0x5), region = 70 }
 0x126   :  { %433 = vsyncpa [#allocation3], 1 }
 0x127   :  { %435 = vsyncpa [#allocation3 + $0x1], 1 }

</bundles_post_ra>
